<compile_context>
chip_gen: v5e
topology: v5e:2x2
jax: 0.10.0
libtpu: 0.0.40
codegen_flags: <defaults>
</compile_context>

<pallas_src>
import jax
import jax.numpy as jnp
from jax.experimental import pallas as pl
from jax.experimental.pallas import tpu as pltpu


def _gem_kernel(eps, kernel_size):
    inv_k = 1.0 / float(kernel_size)

    def kernel(p_ref, x_ref, pool_ref, o_ref):
        p = p_ref[0]                                  # learnable exponent (SMEM scalar)
        inv_p = 1.0 / p                               # scalar reciprocal once
        x = x_ref[...].astype(jnp.float32)            # (TR, TL)
        x = jnp.maximum(x, eps)                       # clamp(min=eps) -> strictly positive
        xp = jnp.exp(p * jnp.log(x))                  # x ** p  (2 EUP ops / input elem)
        # Window sums on the MXU: bf16 hi/lo split of xp against the 0/1
        # block-diagonal matrix (exact in bf16), f32 accumulation -> ~f32
        # accuracy at full-rate bf16 MXU throughput.
        xp_hi = xp.astype(jnp.bfloat16)
        xp_lo = (xp - xp_hi.astype(jnp.float32)).astype(jnp.bfloat16)
        pool = pool_ref[...]                          # (TL, TLo) bf16, entries 0/1
        win_sum = (jnp.dot(xp_hi, pool, preferred_element_type=jnp.float32)
                   + jnp.dot(xp_lo, pool, preferred_element_type=jnp.float32))
        pooled = win_sum * inv_k                      # mean over the window
        # pooled >= 0; pooled == 0 -> log -> -inf -> exp -> 0, which matches
        # PyTorch's pow(0, 1/p) in f32.
        o_ref[...] = jnp.exp(jnp.log(pooled) * inv_p).astype(o_ref.dtype)

    return kernel


def _round_up(v, m):
    return ((v + m - 1) // m) * m


def _mxu_is_256_wide():
    """v6e / v7x have a 256-wide MXU; v2-v5 are 128-wide."""
    try:
        kind = jax.devices()[0].device_kind.lower()
    except Exception:
        return True
    return not any(g in kind for g in ("v2", "v3", "v4", "v5"))


def gem_pallas(x, p, kernel_size=8, eps=1e-6):
    """x: (N, C, L), p: (1,) float32. Returns (N, C, L // kernel_size)."""
    N, C, L = x.shape
    K = int(kernel_size)
    assert L % K == 0, "L must be divisible by kernel_size (non-overlapping pooling)"
    Lo = L // K

    # Fold batch & channels into one row axis: better sublane utilization for
    # small C/N and more independent, evenly-sized grid work.
    NC = N * C
    x2 = x.reshape(NC, L)

    # ---- output-column (lane) tile: generation-aware, lane-dense -----------
    lane_candidates = (256, 128) if _mxu_is_256_wide() else (128,)
    TLo = None
    Lo_pad = Lo
    for c in lane_candidates:
        if Lo % c == 0:
            TLo = c
            break
    if TLo is None:
        if Lo <= lane_candidates[-1]:
            TLo = Lo                          # small Lo: full-extent lane block
        else:
            TLo = lane_candidates[-1]         # pad Lo up to a lane-dense multiple
            Lo_pad = _round_up(Lo, TLo)
    TL = TLo * K

    if Lo_pad != Lo:
        # Pad with eps (finite) so padded lanes cannot inject NaN/Inf into
        # valid output columns through the matmul's zero entries.
        x2 = jnp.pad(x2, ((0, 0), (0, (Lo_pad - Lo) * K)), constant_values=eps)

    # ---- row tile: fixed size + ragged grid ---------------------------------
    # Rows never mix in the block-diagonal matmul and out-of-bounds output
    # rows are not written back, so ragged row blocks are safe.
    TR = 256 if TLo >= 256 else 512           # ~2 MiB f32 x-tile either way
    TR = min(TR, _round_up(NC, 8))
    while TR > 8 and TR * TL * 4 > 4 * 1024 * 1024:   # cap the x-tile at 4 MiB
        TR //= 2
    TR = max(8, (TR // 8) * 8)

    grid = (pl.cdiv(NC, TR), Lo_pad // TLo)

    # Single (TL, TLo) 0/1 block of the block-diagonal window-sum matrix.
    # Exact in bf16; constant block index -> DMA'd into VMEM only once.
    rows = jnp.arange(TL)[:, None] // K
    cols = jnp.arange(TLo)[None, :]
    pool_blk = (rows == cols).astype(jnp.bfloat16)

    def run(single_buffer_pool):
        if single_buffer_pool:
            pool_spec = pl.BlockSpec((TL, TLo), lambda r, l: (0, 0),
                                     pipeline_mode=pl.Buffered(1))
        else:
            pool_spec = pl.BlockSpec((TL, TLo), lambda r, l: (0, 0))
        return pl.pallas_call(
            _gem_kernel(eps, K),
            out_shape=jax.ShapeDtypeStruct((NC, Lo_pad), x.dtype),
            grid=grid,
            in_specs=[
                pl.BlockSpec(memory_space=pltpu.MemorySpace.SMEM),   # p scalar
                pl.BlockSpec((TR, TL), lambda r, l: (r, l)),         # x tile
                pool_spec,                                           # const pool block
            ],
            out_specs=pl.BlockSpec((TR, TLo), lambda r, l: (r, l)),
            compiler_params=pltpu.CompilerParams(
                # no reduction axis -> fully parallel; shards across TCs on v7x
                dimension_semantics=("parallel", "parallel"),
                # worst-case buffers + temps stay well under this on v5e/v6e/v7x
                vmem_limit_bytes=32 * 1024 * 1024,
            ),
        )(p, x2, pool_blk)

    try:
        out2 = run(True)
    except Exception:
        # Fallback: if this jax build rejects single-buffering of the constant
        # pool block, default double-buffering only costs one dead ~1 MiB copy.
        out2 = run(False)

    if Lo_pad != Lo:
        out2 = out2[:, :Lo]
    return out2.reshape(N, C, Lo)


def gem_ref(x, p, kernel_size=8, eps=1e-6):
    """Pure-JAX reference matching the PyTorch module."""
    N, C, L = x.shape
    xp = jnp.maximum(x, eps) ** p[0]
    pooled = xp.reshape(N, C, L // kernel_size, kernel_size).mean(axis=-1)
    return pooled ** (1.0 / p[0])


if __name__ == "__main__":
    key = jax.random.PRNGKey(0)
    N, C, L = 2, 4, 16
    kernel_size = 8
    eps = 1e-6

    x = jax.random.normal(key, (N, C, L), dtype=jnp.float32)
    # nn.Parameter(torch.ones(1) * 3) -> deterministic init
    p = jnp.ones((1,), dtype=jnp.float32) * 3.0

    out = gem_pallas(x, p, kernel_size=kernel_size, eps=eps)
    out = jax.block_until_ready(out)

    ref = gem_ref(x, p, kernel_size=kernel_size, eps=eps)
    assert out.shape == (N, C, L // kernel_size)
    assert jnp.allclose(out, ref, atol=1e-4, rtol=1e-4), "mismatch vs reference"

    print("KERNEL_OK")
</pallas_src>

<mosaic_0001>
module attributes {stable_mosaic.version = 11 : i64} {
  func.func @kernel(%arg0: i32, %arg1: i32, %arg2: memref<1xf32, #tpu.memory_space<smem>>, %arg3: memref<8x16xf32, #tpu.memory_space<vmem>>, %arg4: memref<16x2xbf16, #tpu.memory_space<vmem>>, %arg5: memref<8x2xf32, #tpu.memory_space<vmem>>) attributes {dimension_semantics = [#tpu.dimension_semantics<parallel>, #tpu.dimension_semantics<parallel>], iteration_bounds = array<i64: 1, 1>, scalar_prefetch = 0 : i64, scratch_operands = 0 : i64, tpu.core_type = #tpu.core_type<tc>, window_params = [{transform_indices = @transform_0, window_bounds = array<i64: 1>}, {transform_indices = @transform_1, window_bounds = array<i64: 8, 16>}, {pipeline_mode = #tpu.pipeline_mode<synchronous>, transform_indices = @transform_2, window_bounds = array<i64: 16, 2>}, {transform_indices = @transform_3, window_bounds = array<i64: 8, 2>}]} {
    %c0 = arith.constant 0 : index
    %0 = memref.load %arg2[%c0] : memref<1xf32, #tpu.memory_space<smem>>
    %cst = arith.constant 1.000000e+00 : f32
    %1 = arith.divf %cst, %0 : f32
    %c0_0 = arith.constant 0 : index
    %c0_1 = arith.constant 0 : index
    %2 = vector.load %arg3[%c0_0, %c0_1] : memref<8x16xf32, #tpu.memory_space<vmem>>, vector<8x16xf32>
    %cst_2 = arith.constant 9.99999997E-7 : f32
    %3 = vector.broadcast %cst_2 : f32 to vector<8x16xf32>
    %4 = arith.maximumf %2, %3 : vector<8x16xf32>
    %5 = math.log %4 : vector<8x16xf32>
    %6 = vector.broadcast %0 : f32 to vector<8x16xf32>
    %7 = arith.mulf %6, %5 : vector<8x16xf32>
    %8 = math.exp %7 : vector<8x16xf32>
    %9 = arith.truncf %8 : vector<8x16xf32> to vector<8x16xbf16>
    %10 = arith.extf %9 : vector<8x16xbf16> to vector<8x16xf32>
    %11 = arith.subf %8, %10 : vector<8x16xf32>
    %12 = arith.truncf %11 : vector<8x16xf32> to vector<8x16xbf16>
    %c0_3 = arith.constant 0 : index
    %c0_4 = arith.constant 0 : index
    %13 = vector.load %arg4[%c0_3, %c0_4] : memref<16x2xbf16, #tpu.memory_space<vmem>>, vector<16x2xbf16>
    %cst_5 = arith.constant dense<0.000000e+00> : vector<8x2xf32>
    %14 = tpu.matmul %9, %13, %cst_5 {dimension_numbers = #tpu.dot_dimension_numbers<[1], [0], [0], [1], [0, 0, 1, 1], [], []>} : vector<8x16xbf16>, vector<16x2xbf16>, vector<8x2xf32> -> vector<8x2xf32>
    %cst_6 = arith.constant dense<0.000000e+00> : vector<8x2xf32>
    %15 = tpu.matmul %12, %13, %cst_6 {dimension_numbers = #tpu.dot_dimension_numbers<[1], [0], [0], [1], [0, 0, 1, 1], [], []>} : vector<8x16xbf16>, vector<16x2xbf16>, vector<8x2xf32> -> vector<8x2xf32>
    %16 = arith.addf %14, %15 : vector<8x2xf32>
    %cst_7 = arith.constant 1.250000e-01 : f32
    %17 = vector.broadcast %cst_7 : f32 to vector<8x2xf32>
    %18 = arith.mulf %16, %17 : vector<8x2xf32>
    %19 = math.log %18 : vector<8x2xf32>
    %20 = vector.broadcast %1 : f32 to vector<8x2xf32>
    %21 = arith.mulf %19, %20 : vector<8x2xf32>
    %22 = math.exp %21 : vector<8x2xf32>
    %c0_8 = arith.constant 0 : index
    %c0_9 = arith.constant 0 : index
    %23 = vector.load %arg5[%c0_8, %c0_9] : memref<8x2xf32, #tpu.memory_space<vmem>>, vector<8x2xf32>
    tpu.vector_store %arg5[%c0_8, %c0_9], %22 {strides = array<i32>} : memref<8x2xf32, #tpu.memory_space<vmem>>, vector<8x2xf32>,
    return
  }
  func.func @transform_0(%arg0: i32, %arg1: i32) -> i32 {
    %c0_i32 = arith.constant 0 : i32
    %c0_i32_0 = arith.constant 0 : i32
    return %c0_i32 : i32
  }
  func.func @transform_1(%arg0: i32, %arg1: i32) -> (i32, i32) {
    %c0_i32 = arith.constant 0 : i32
    return %arg0, %arg1 : i32, i32
  }
  func.func @transform_2(%arg0: i32, %arg1: i32) -> (i32, i32) {
    %c0_i32 = arith.constant 0 : i32
    %c0_i32_0 = arith.constant 0 : i32
    %c0_i32_1 = arith.constant 0 : i32
    return %c0_i32, %c0_i32_0 : i32, i32
  }
  func.func @transform_3(%arg0: i32, %arg1: i32) -> (i32, i32) {
    %c0_i32 = arith.constant 0 : i32
    return %arg0, %arg1 : i32, i32
  }
}

module attributes {stable_mosaic.version = 11 : i64} {
  func.func @kernel(%arg0: i32, %arg1: i32, %arg2: memref<1xf32, #tpu.memory_space<smem>>, %arg3: memref<8x16xf32, #tpu.memory_space<vmem>>, %arg4: memref<16x2xbf16, #tpu.memory_space<vmem>>, %arg5: memref<8x2xf32, #tpu.memory_space<vmem>>) attributes {dimension_semantics = [#tpu.dimension_semantics<parallel>, #tpu.dimension_semantics<parallel>], iteration_bounds = array<i64: 1, 1>, scalar_prefetch = 0 : i64, scratch_operands = 0 : i64, tpu.core_type = #tpu.core_type<tc>, window_params = [{transform_indices = @transform_0, window_bounds = array<i64: 1>}, {transform_indices = @transform_1, window_bounds = array<i64: 8, 16>}, {pipeline_mode = #tpu.pipeline_mode<synchronous>, transform_indices = @transform_2, window_bounds = array<i64: 16, 2>}, {transform_indices = @transform_3, window_bounds = array<i64: 8, 2>}]} {
    %c0 = arith.constant 0 : index
    %0 = memref.load %arg2[%c0] : memref<1xf32, #tpu.memory_space<smem>>
    %cst = arith.constant 1.000000e+00 : f32
    %1 = arith.divf %cst, %0 : f32
    %c0_0 = arith.constant 0 : index
    %c0_1 = arith.constant 0 : index
    %2 = vector.load %arg3[%c0_0, %c0_1] : memref<8x16xf32, #tpu.memory_space<vmem>>, vector<8x16xf32>
    %cst_2 = arith.constant 9.99999997E-7 : f32
    %3 = vector.broadcast %cst_2 : f32 to vector<8x16xf32>
    %4 = arith.maximumf %2, %3 : vector<8x16xf32>
    %5 = math.log %4 : vector<8x16xf32>
    %6 = vector.broadcast %0 : f32 to vector<8x16xf32>
    %7 = arith.mulf %6, %5 : vector<8x16xf32>
    %8 = math.exp %7 : vector<8x16xf32>
    %9 = arith.truncf %8 : vector<8x16xf32> to vector<8x16xbf16>
    %10 = arith.extf %9 : vector<8x16xbf16> to vector<8x16xf32>
    %11 = arith.subf %8, %10 : vector<8x16xf32>
    %12 = arith.truncf %11 : vector<8x16xf32> to vector<8x16xbf16>
    %c0_3 = arith.constant 0 : index
    %c0_4 = arith.constant 0 : index
    %13 = vector.load %arg4[%c0_3, %c0_4] : memref<16x2xbf16, #tpu.memory_space<vmem>>, vector<16x2xbf16>
    %cst_5 = arith.constant dense<0.000000e+00> : vector<8x2xf32>
    %14 = tpu.matmul %9, %13, %cst_5 {dimension_numbers = #tpu.dot_dimension_numbers<[1], [0], [0], [1], [0, 0, 1, 1], [], []>} : vector<8x16xbf16>, vector<16x2xbf16>, vector<8x2xf32> -> vector<8x2xf32>
    %cst_6 = arith.constant dense<0.000000e+00> : vector<8x2xf32>
    %15 = tpu.matmul %12, %13, %cst_6 {dimension_numbers = #tpu.dot_dimension_numbers<[1], [0], [0], [1], [0, 0, 1, 1], [], []>} : vector<8x16xbf16>, vector<16x2xbf16>, vector<8x2xf32> -> vector<8x2xf32>
    %16 = arith.addf %14, %15 : vector<8x2xf32>
    %cst_7 = arith.constant 1.250000e-01 : f32
    %17 = vector.broadcast %cst_7 : f32 to vector<8x2xf32>
    %18 = arith.mulf %16, %17 : vector<8x2xf32>
    %19 = math.log %18 : vector<8x2xf32>
    %20 = vector.broadcast %1 : f32 to vector<8x2xf32>
    %21 = arith.mulf %19, %20 : vector<8x2xf32>
    %22 = math.exp %21 : vector<8x2xf32>
    %c0_8 = arith.constant 0 : index
    %c0_9 = arith.constant 0 : index
    %23 = vector.load %arg5[%c0_8, %c0_9] : memref<8x2xf32, #tpu.memory_space<vmem>>, vector<8x2xf32>
    tpu.vector_store %arg5[%c0_8, %c0_9], %22 {strides = array<i32>} : memref<8x2xf32, #tpu.memory_space<vmem>>, vector<8x2xf32>,
    return
  }
  func.func @transform_0(%arg0: i32, %arg1: i32) -> i32 {
    %c0_i32 = arith.constant 0 : i32
    %c0_i32_0 = arith.constant 0 : i32
    return %c0_i32 : i32
  }
  func.func @transform_1(%arg0: i32, %arg1: i32) -> (i32, i32) {
    %c0_i32 = arith.constant 0 : i32
    return %arg0, %arg1 : i32, i32
  }
  func.func @transform_2(%arg0: i32, %arg1: i32) -> (i32, i32) {
    %c0_i32 = arith.constant 0 : i32
    %c0_i32_0 = arith.constant 0 : i32
    %c0_i32_1 = arith.constant 0 : i32
    return %c0_i32, %c0_i32_0 : i32, i32
  }
  func.func @transform_3(%arg0: i32, %arg1: i32) -> (i32, i32) {
    %c0_i32 = arith.constant 0 : i32
    return %arg0, %arg1 : i32, i32
  }
}

</mosaic_0001>

<bundles_post_ra>
// kernel: tpu_custom_call.1
= control target key start
LH: loop header
LB: loop body
LE: loop exit
PB: predicated region body
PF: predicated region fallthrough
CT: control target
= control target key end

     0   :  { %vm53_vm4 = vcmask 130048   ;;  %vm93_vm5 = vcmask 15360   ;;  %s150_s2 = inlined_call_operand.vmem [shape: bf16[16,2], index: 2, kind: input, shape index: {}]   ;;  %s151_s0 = inlined_call_operand.<no memory space> [shape: f32[1], index: 0, kind: input, shape index: {}]   ;;  %s152_s1 = inlined_call_operand.vmem [shape: f32[8,16], index: 1, kind: input, shape index: {}]   ;;  %s153_s3 = inlined_call_operand.vmem [shape: f32[8,2], index: 3, kind: output, shape index: {}]  }
   0x1   :  { %v105_v0 = vld [vmem:[%s150_s2] sm:$0xff]  ;;  %v17_v1 = vstv %s151_s0 }
   0x2   :  { %v33_v2 = vld [vmem:[%s152_s1] sm:$0xff]  ;;  %108 = vrcp.f32 %v17_v1  ;;  %80 = vmatpush.bf16.msra.mxu1 %v105_v0  ;;  %64 = vmatpush.bf16.msra.mxu0 %v105_v0  ;;  %vm23_vm0 = vweird.f32 %v17_v1  ;;  %v29_v7 = vand.u32 2147483648, %v17_v1  ;;  %v27_v10 = vand.u32 2147483647, %v17_v1 }
   0x3   :  { %v34_v3 = vmax.f32 %v33_v2, 1e-06 }
   0x4   :  { %v30_v13 = vor.u32 1.1754944e-38, %v29_v7  ;;  %vm28_vm3 = vcmp.eq.f32.partialorder %v27_v10, 8.507059e+37 }
   0x5   :  { %110 = vlog2.f32 %v34_v3 }
   0x8   :  { %v109_v4 = vpop.eup %108 }
   0x9   :  { %v19_v5 = vmul.f32 %v109_v4, %v17_v1  ;;  %vm24_vm1 = vweird.f32 %v109_v4 }
   0xa   :  { %vm25_vm2 = vmor %vm23_vm0, %vm24_vm1 }
   0xb   :  { %v111_v6 = vpop.eup %110  ;;  %v20_v9 = vsub.f32 1.0, %v19_v5 }
   0xc   :  { %v36_v8 = vmul.f32 0.6931472, %v111_v6 }
   0xd   :  { %v21_v12 = vmul.f32 %v109_v4, %v20_v9 }
   0xe   :  { %v38_v11 = vmul.f32 %v36_v8, %v17_v1 }
   0xf   :  { %v22_v15 = vadd.f32 %v109_v4, %v21_v12 }
  0x10   :  { %v39_v14 = vmul.f32 1.442695, %v38_v11 }
  0x11   :  { %v26_v16 = vsel %vm25_vm2, %v109_v4, %v22_v15 }
  0x12   :  { %112 = vpow2.f32 %v39_v14  ;;  %v31_v17 = vsel %vm28_vm3, %v30_v13, %v26_v16 }
  0x13   :  { %106 = vpush %v31_v17 }
  0x18   :  { %v113_v18 = vpop.eup %112 }
  0x19   :  { %v41_v19 = vpack.c.bf16 %v113_v18, %v113_v18 }
  0x1b   :  { %v42_v20 = vunpack.c.l.bf16 %v41_v19  ;;  %104 = vmatmul.msk.bf16.vlgmr.msra.gmra.mxu1 %vm53_vm4, %v41_v19 }
  0x1d   :  { %v43_v21 = vsub.f32 %v113_v18, %v42_v20 }
  0x1f   :  { %v44_v22 = vpack.c.bf16 %v43_v21, %v43_v21 }
  0x21   :  { %103 = vmatmul.msk.bf16.vlgmr.msra.gmra.mxu0 %vm53_vm4, %v44_v22 }
  0x44   :  { %s107_s0 = spop %106 }
  0x45   :  { %v89_v30 = vstv %s107_s0 }
  0x98   :  { %v82_v23 = vpop.f32.mrf.mxu1 }
  0x9e   :  { %v66_v24 = vpop.f32.mrf.mxu0 }
  0x9f   :  { %v83_v25 = vadd.f32 %v82_v23, %v66_v24 }
  0xa0   :  { %v84_v26 = vpop.f32.mrf.mxu1 }
  0xa1   :  { %v86_v27 = vmul.f32 0.125, %v83_v25 }
  0xa3   :  { %114 = vlog2.f32 %v86_v27 }
  0xa6   :  { %v68_v28 = vpop.f32.mrf.mxu0 }
  0xa9   :  { %v115_v29 = vpop.eup %114 }
  0xaa   :  { %v88_v31 = vmul.f32 0.6931472, %v115_v29 }
  0xac   :  { %v90_v32 = vmul.f32 %v89_v30, %v88_v31 }
  0xae   :  { %v91_v33 = vmul.f32 1.442695, %v90_v32 }
  0xb0   :  { %116 = vpow2.f32 %v91_v33 }
  0xb6   :  { %v117_v34 = vpop.eup %116 }
  0xb7   :  { %94 = vst.msk [vmem:[%s153_s3] sm:$0xff] %vm93_vm5, %v117_v34 }

// kernel: tpu_custom_call.1
= control target key start
LH: loop header
LB: loop body
LE: loop exit
PB: predicated region body
PF: predicated region fallthrough
CT: control target
= control target key end

     0   :  { %vm53_vm4 = vcmask 130048   ;;  %vm93_vm5 = vcmask 15360   ;;  %s150_s2 = inlined_call_operand.vmem [shape: bf16[16,2], index: 2, kind: input, shape index: {}]   ;;  %s151_s0 = inlined_call_operand.<no memory space> [shape: f32[1], index: 0, kind: input, shape index: {}]   ;;  %s152_s1 = inlined_call_operand.vmem [shape: f32[8,16], index: 1, kind: input, shape index: {}]   ;;  %s153_s3 = inlined_call_operand.vmem [shape: f32[8,2], index: 3, kind: output, shape index: {}]  }
   0x1   :  { %v105_v0 = vld [vmem:[%s150_s2] sm:$0xff]  ;;  %v17_v1 = vstv %s151_s0 }
   0x2   :  { %v33_v2 = vld [vmem:[%s152_s1] sm:$0xff]  ;;  %108 = vrcp.f32 %v17_v1  ;;  %80 = vmatpush.bf16.msra.mxu1 %v105_v0  ;;  %64 = vmatpush.bf16.msra.mxu0 %v105_v0  ;;  %vm23_vm0 = vweird.f32 %v17_v1  ;;  %v29_v7 = vand.u32 2147483648, %v17_v1  ;;  %v27_v10 = vand.u32 2147483647, %v17_v1 }
   0x3   :  { %v34_v3 = vmax.f32 %v33_v2, 1e-06 }
   0x4   :  { %v30_v13 = vor.u32 1.1754944e-38, %v29_v7  ;;  %vm28_vm3 = vcmp.eq.f32.partialorder %v27_v10, 8.507059e+37 }
   0x5   :  { %110 = vlog2.f32 %v34_v3 }
   0x8   :  { %v109_v4 = vpop.eup %108 }
   0x9   :  { %v19_v5 = vmul.f32 %v109_v4, %v17_v1  ;;  %vm24_vm1 = vweird.f32 %v109_v4 }
   0xa   :  { %vm25_vm2 = vmor %vm23_vm0, %vm24_vm1 }
   0xb   :  { %v111_v6 = vpop.eup %110  ;;  %v20_v9 = vsub.f32 1.0, %v19_v5 }
   0xc   :  { %v36_v8 = vmul.f32 0.6931472, %v111_v6 }
   0xd   :  { %v21_v12 = vmul.f32 %v109_v4, %v20_v9 }
   0xe   :  { %v38_v11 = vmul.f32 %v36_v8, %v17_v1 }
   0xf   :  { %v22_v15 = vadd.f32 %v109_v4, %v21_v12 }
  0x10   :  { %v39_v14 = vmul.f32 1.442695, %v38_v11 }
  0x11   :  { %v26_v16 = vsel %vm25_vm2, %v109_v4, %v22_v15 }
  0x12   :  { %112 = vpow2.f32 %v39_v14  ;;  %v31_v17 = vsel %vm28_vm3, %v30_v13, %v26_v16 }
  0x13   :  { %106 = vpush %v31_v17 }
  0x18   :  { %v113_v18 = vpop.eup %112 }
  0x19   :  { %v41_v19 = vpack.c.bf16 %v113_v18, %v113_v18 }
  0x1b   :  { %v42_v20 = vunpack.c.l.bf16 %v41_v19  ;;  %104 = vmatmul.msk.bf16.vlgmr.msra.gmra.mxu1 %vm53_vm4, %v41_v19 }
  0x1d   :  { %v43_v21 = vsub.f32 %v113_v18, %v42_v20 }
  0x1f   :  { %v44_v22 = vpack.c.bf16 %v43_v21, %v43_v21 }
  0x21   :  { %103 = vmatmul.msk.bf16.vlgmr.msra.gmra.mxu0 %vm53_vm4, %v44_v22 }
  0x44   :  { %s107_s0 = spop %106 }
  0x45   :  { %v89_v30 = vstv %s107_s0 }
  0x98   :  { %v82_v23 = vpop.f32.mrf.mxu1 }
  0x9e   :  { %v66_v24 = vpop.f32.mrf.mxu0 }
  0x9f   :  { %v83_v25 = vadd.f32 %v82_v23, %v66_v24 }
  0xa0   :  { %v84_v26 = vpop.f32.mrf.mxu1 }
  0xa1   :  { %v86_v27 = vmul.f32 0.125, %v83_v25 }
  0xa3   :  { %114 = vlog2.f32 %v86_v27 }
  0xa6   :  { %v68_v28 = vpop.f32.mrf.mxu0 }
  0xa9   :  { %v115_v29 = vpop.eup %114 }
  0xaa   :  { %v88_v31 = vmul.f32 0.6931472, %v115_v29 }
  0xac   :  { %v90_v32 = vmul.f32 %v89_v30, %v88_v31 }
  0xae   :  { %v91_v33 = vmul.f32 1.442695, %v90_v32 }
  0xb0   :  { %116 = vpow2.f32 %v91_v33 }
  0xb6   :  { %v117_v34 = vpop.eup %116 }
  0xb7   :  { %94 = vst.msk [vmem:[%s153_s3] sm:$0xff] %vm93_vm5, %v117_v34 }

</bundles_post_ra>
